<compile_context>
chip_gen: v5e
topology: v5e:2x2
jax: 0.10.0
libtpu: 0.0.40
codegen_flags: <defaults>
</compile_context>

<pallas_src>
import functools

import jax
import jax.numpy as jnp
from jax.experimental import pallas as pl
from jax.experimental.pallas import tpu as pltpu

_PAD = 128  # lane-aligned padded width for every layer's in/out features


def _round_up(a, m):
    return (a + m - 1) // m * m


# ---------------------------------------------------------------------------
# Kernel
# ---------------------------------------------------------------------------
def _make_mlp_kernel(n_layers, k0):
    """k0 = padded input-feature width (multiple of 16) used for layer 0's K."""

    def kernel(x_ref, w_ref, b_ref, o_ref):
        # x tile arrives in f32; cast to bf16 once, in-register (saves a separate
        # HBM cast pass in the wrapper).
        h = x_ref[...].astype(jnp.bfloat16)                       # (TB, k0) bf16
        for layer in range(n_layers):                             # static unroll (7)
            if layer == 0 and k0 < _PAD:
                w = w_ref[layer, :k0, :]                          # (k0, 128) bf16
            else:
                w = w_ref[layer]                                  # (128, 128) bf16
            # MXU matmul in bf16, accumulate in f32.
            acc = jnp.dot(h, w, preferred_element_type=jnp.float32)   # (TB, 128) f32
            acc = acc + b_ref[layer:layer + 1, :]                 # f32 bias add (VPU)
            if layer < n_layers - 1:
                # ReLU in f32; dropout is identity in eval mode.
                h = jnp.maximum(acc, 0.0).astype(jnp.bfloat16)
            else:
                # Only column 0 of the zero-padded final layer is real.
                o_ref[...] = acc[:, :1].astype(o_ref.dtype)
        # TODO(synk): training-mode dropout would need pltpu.prng_seed /
        # pltpu.prng_random_bits; eval-mode (identity) is implemented here.

    return kernel


# ---------------------------------------------------------------------------
# One-time parameter packing (hoisted out of the per-call path)
# ---------------------------------------------------------------------------
def pack_params(params):
    """Pack all (W, b) pairs into two small resident-VMEM slabs.

    params: list of (W, b) with W already transposed to (d_in, d_out), f32.
    Returns (w_slab bf16 (L,128,128), b_slab f32 (L,128)).
    Zero padding keeps the math exact: padded rows/cols/bias entries are 0,
    so padded activation lanes stay 0 through the whole chain.
    """
    n_layers = len(params)
    for i, (w, b) in enumerate(params):
        assert w.shape[0] <= _PAD and w.shape[1] <= _PAD, (
            f"layer {i}: weight {w.shape} exceeds padded width {_PAD}")
        assert b.shape[0] <= _PAD, f"layer {i}: bias {b.shape} exceeds {_PAD}"
    w_slab = jnp.zeros((n_layers, _PAD, _PAD), jnp.float32)
    b_slab = jnp.zeros((n_layers, _PAD), jnp.float32)
    for i, (w, b) in enumerate(params):
        w_slab = w_slab.at[i, : w.shape[0], : w.shape[1]].set(w)
        b_slab = b_slab.at[i, : b.shape[0]].set(b)
    return w_slab.astype(jnp.bfloat16), b_slab


# ---------------------------------------------------------------------------
# Forward
# ---------------------------------------------------------------------------
@functools.partial(jax.jit, static_argnames=("block_rows",))
def pitch_velocity_forward(x, w_slab, b_slab, *, block_rows=1024):
    """x: (B, num_features) f32. w_slab/b_slab from pack_params()."""
    n_layers = w_slab.shape[0]
    B, f_in = x.shape
    f_in_pad = _round_up(f_in, 16)               # bf16 sublane pack = 16

    # --- batch-adaptive row tile ---
    block_rows = max(16, _round_up(block_rows, 16))
    b16 = _round_up(B, 16)
    tb = min(block_rows, b16)
    # v7x megacore: if the batch can feed two TensorCores but the grid would be a
    # single tile, split into two (harmless on single-core v5e/v6e).
    if b16 >= 1024 and tb == b16:
        tb = _round_up(pl.cdiv(b16, 2), 16)
    b_pad = _round_up(B, tb)

    # --- tail-only padding (skipped entirely when already aligned) ---
    pad_rows, pad_cols = b_pad - B, f_in_pad - f_in
    if pad_rows or pad_cols:
        x = jnp.pad(x, ((0, pad_rows), (0, pad_cols)))

    kernel = _make_mlp_kernel(n_layers, f_in_pad)
    out = pl.pallas_call(
        kernel,
        out_shape=jax.ShapeDtypeStruct((b_pad, 1), jnp.float32),
        grid_spec=pltpu.PrefetchScalarGridSpec(
            num_scalar_prefetch=0,
            grid=(b_pad // tb,),
            in_specs=[
                # Batch tile: pipelined / double-buffered across grid steps.
                pl.BlockSpec((tb, f_in_pad), lambda i: (i, 0)),
                # Weight + bias slabs: constant block index => resident in VMEM,
                # DMA'd once (3 input DMAs total instead of 15 small ones).
                pl.BlockSpec((n_layers, _PAD, _PAD), lambda i: (0, 0, 0)),
                pl.BlockSpec((n_layers, _PAD), lambda i: (0, 0)),
            ],
            out_specs=pl.BlockSpec((tb, 1), lambda i: (i, 0)),
        ),
        compiler_params=pltpu.CompilerParams(
            # Batch tiles are independent -> shard across v7x's two TensorCores.
            dimension_semantics=("parallel",),
        ),
    )(x, w_slab, b_slab)
    return out[:B]


# ---------------------------------------------------------------------------
# Reference + init
# ---------------------------------------------------------------------------
def _reference_forward_bf16(x, params):
    """Pure-JAX reference mirroring the kernel's precision (bf16 matmul, f32 acc)."""
    h = x.astype(jnp.bfloat16)
    n = len(params)
    for i, (w, b) in enumerate(params):
        acc = jnp.dot(h, w.astype(jnp.bfloat16),
                      preferred_element_type=jnp.float32) + b
        if i < n - 1:
            h = jnp.maximum(acc, 0.0).astype(jnp.bfloat16)
        else:
            return acc


def init_params(key, num_features, layer_sizes):
    """Deterministic synthetic init (PyTorch-like uniform fan-in scaling)."""
    dims = [num_features] + list(layer_sizes) + [1]
    params = []
    for i in range(len(dims) - 1):
        key, kw, kb = jax.random.split(key, 3)
        fan_in, fan_out = dims[i], dims[i + 1]
        bound = 1.0 / jnp.sqrt(fan_in)
        # Stored already transposed: (in, out)
        w = jax.random.uniform(kw, (fan_in, fan_out), jnp.float32, -bound, bound)
        b = jax.random.uniform(kb, (fan_out,), jnp.float32, -bound, bound)
        params.append((w, b))
    return params


if __name__ == "__main__":
    key = jax.random.PRNGKey(0)

    num_features = 32
    layer_sizes = [64, 64, 32, 32, 64, 32]   # six hidden layer widths (fc1..fc6 outputs)

    params = init_params(key, num_features, layer_sizes)
    w_slab, b_slab = pack_params(params)     # packed ONCE at init

    # --- small batch (original test shape): single 16-row tile ---
    key, kx = jax.random.split(key)
    x_small = jax.random.normal(kx, (8, num_features), jnp.float32)
    out_small = jax.block_until_ready(pitch_velocity_forward(x_small, w_slab, b_slab))
    ref_small = _reference_forward_bf16(x_small, params)
    assert out_small.shape == (8, 1), out_small.shape
    err_s = jnp.max(jnp.abs(out_small - ref_small))
    assert jnp.allclose(out_small, ref_small, atol=1e-2, rtol=1e-2), f"small max err {err_s}"

    # --- larger batch: exercises the multi-tile pipelined grid (2 x 1024 rows) ---
    key, kx2 = jax.random.split(key)
    x_big = jax.random.normal(kx2, (2048, num_features), jnp.float32)
    out_big = jax.block_until_ready(pitch_velocity_forward(x_big, w_slab, b_slab))
    ref_big = _reference_forward_bf16(x_big, params)
    assert out_big.shape == (2048, 1), out_big.shape
    err_b = jnp.max(jnp.abs(out_big - ref_big))
    assert jnp.allclose(out_big, ref_big, atol=1e-2, rtol=1e-2), f"big max err {err_b}"

    print("KERNEL_OK")
</pallas_src>

<mosaic_0001>
module attributes {stable_mosaic.version = 11 : i64} {
  func.func @kernel(%arg0: i32, %arg1: memref<16x32xf32, #tpu.memory_space<vmem>>, %arg2: memref<7x128x128xbf16, #tpu.memory_space<vmem>>, %arg3: memref<7x128xf32, #tpu.memory_space<vmem>>, %arg4: memref<16x1xf32, #tpu.memory_space<vmem>>) attributes {dimension_semantics = [#tpu.dimension_semantics<parallel>], iteration_bounds = array<i64: 1>, scalar_prefetch = 0 : i64, scratch_operands = 0 : i64, tpu.core_type = #tpu.core_type<tc>, window_params = [{transform_indices = @transform_0, window_bounds = array<i64: 16, 32>}, {pipeline_mode = #tpu.pipeline_mode<synchronous>, transform_indices = @transform_1, window_bounds = array<i64: 7, 128, 128>}, {pipeline_mode = #tpu.pipeline_mode<synchronous>, transform_indices = @transform_2, window_bounds = array<i64: 7, 128>}, {transform_indices = @transform_3, window_bounds = array<i64: 16, 1>}]} {
    %c0 = arith.constant 0 : index
    %c0_0 = arith.constant 0 : index
    %0 = vector.load %arg1[%c0, %c0_0] : memref<16x32xf32, #tpu.memory_space<vmem>>, vector<16x32xf32>
    %1 = arith.truncf %0 : vector<16x32xf32> to vector<16x32xbf16>
    %c0_1 = arith.constant 0 : index
    %c0_2 = arith.constant 0 : index
    %c0_3 = arith.constant 0 : index
    %2 = vector.load %arg2[%c0_1, %c0_2, %c0_3] : memref<7x128x128xbf16, #tpu.memory_space<vmem>>, vector<1x32x128xbf16>
    %3 = vector.shape_cast %2 : vector<1x32x128xbf16> to vector<32x128xbf16>
    %cst = arith.constant dense<0.000000e+00> : vector<16x128xf32>
    %4 = tpu.matmul %1, %3, %cst {dimension_numbers = #tpu.dot_dimension_numbers<[1], [0], [0], [1], [0, 0, 1, 1], [], []>} : vector<16x32xbf16>, vector<32x128xbf16>, vector<16x128xf32> -> vector<16x128xf32>
    %c0_4 = arith.constant 0 : index
    %c0_5 = arith.constant 0 : index
    %5 = vector.load %arg3[%c0_4, %c0_5] : memref<7x128xf32, #tpu.memory_space<vmem>>, vector<1x128xf32>
    %6 = vector.broadcast %5 : vector<1x128xf32> to vector<16x128xf32>
    %7 = arith.addf %4, %6 : vector<16x128xf32>
    %cst_6 = arith.constant 0.000000e+00 : f32
    %8 = vector.broadcast %cst_6 : f32 to vector<16x128xf32>
    %9 = arith.maximumf %7, %8 : vector<16x128xf32>
    %10 = arith.truncf %9 : vector<16x128xf32> to vector<16x128xbf16>
    %c1 = arith.constant 1 : index
    %c0_7 = arith.constant 0 : index
    %c0_8 = arith.constant 0 : index
    %11 = vector.load %arg2[%c1, %c0_7, %c0_8] : memref<7x128x128xbf16, #tpu.memory_space<vmem>>, vector<1x128x128xbf16>
    %12 = vector.shape_cast %11 : vector<1x128x128xbf16> to vector<128x128xbf16>
    %cst_9 = arith.constant dense<0.000000e+00> : vector<16x128xf32>
    %13 = tpu.matmul %10, %12, %cst_9 {dimension_numbers = #tpu.dot_dimension_numbers<[1], [0], [0], [1], [0, 0, 1, 1], [], []>} : vector<16x128xbf16>, vector<128x128xbf16>, vector<16x128xf32> -> vector<16x128xf32>
    %c1_10 = arith.constant 1 : index
    %c0_11 = arith.constant 0 : index
    %14 = vector.load %arg3[%c1_10, %c0_11] : memref<7x128xf32, #tpu.memory_space<vmem>>, vector<1x128xf32>
    %15 = vector.broadcast %14 : vector<1x128xf32> to vector<16x128xf32>
    %16 = arith.addf %13, %15 : vector<16x128xf32>
    %cst_12 = arith.constant 0.000000e+00 : f32
    %17 = vector.broadcast %cst_12 : f32 to vector<16x128xf32>
    %18 = arith.maximumf %16, %17 : vector<16x128xf32>
    %19 = arith.truncf %18 : vector<16x128xf32> to vector<16x128xbf16>
    %c2 = arith.constant 2 : index
    %c0_13 = arith.constant 0 : index
    %c0_14 = arith.constant 0 : index
    %20 = vector.load %arg2[%c2, %c0_13, %c0_14] : memref<7x128x128xbf16, #tpu.memory_space<vmem>>, vector<1x128x128xbf16>
    %21 = vector.shape_cast %20 : vector<1x128x128xbf16> to vector<128x128xbf16>
    %cst_15 = arith.constant dense<0.000000e+00> : vector<16x128xf32>
    %22 = tpu.matmul %19, %21, %cst_15 {dimension_numbers = #tpu.dot_dimension_numbers<[1], [0], [0], [1], [0, 0, 1, 1], [], []>} : vector<16x128xbf16>, vector<128x128xbf16>, vector<16x128xf32> -> vector<16x128xf32>
    %c2_16 = arith.constant 2 : index
    %c0_17 = arith.constant 0 : index
    %23 = vector.load %arg3[%c2_16, %c0_17] : memref<7x128xf32, #tpu.memory_space<vmem>>, vector<1x128xf32>
    %24 = vector.broadcast %23 : vector<1x128xf32> to vector<16x128xf32>
    %25 = arith.addf %22, %24 : vector<16x128xf32>
    %cst_18 = arith.constant 0.000000e+00 : f32
    %26 = vector.broadcast %cst_18 : f32 to vector<16x128xf32>
    %27 = arith.maximumf %25, %26 : vector<16x128xf32>
    %28 = arith.truncf %27 : vector<16x128xf32> to vector<16x128xbf16>
    %c3 = arith.constant 3 : index
    %c0_19 = arith.constant 0 : index
    %c0_20 = arith.constant 0 : index
    %29 = vector.load %arg2[%c3, %c0_19, %c0_20] : memref<7x128x128xbf16, #tpu.memory_space<vmem>>, vector<1x128x128xbf16>
    %30 = vector.shape_cast %29 : vector<1x128x128xbf16> to vector<128x128xbf16>
    %cst_21 = arith.constant dense<0.000000e+00> : vector<16x128xf32>
    %31 = tpu.matmul %28, %30, %cst_21 {dimension_numbers = #tpu.dot_dimension_numbers<[1], [0], [0], [1], [0, 0, 1, 1], [], []>} : vector<16x128xbf16>, vector<128x128xbf16>, vector<16x128xf32> -> vector<16x128xf32>
    %c3_22 = arith.constant 3 : index
    %c0_23 = arith.constant 0 : index
    %32 = vector.load %arg3[%c3_22, %c0_23] : memref<7x128xf32, #tpu.memory_space<vmem>>, vector<1x128xf32>
    %33 = vector.broadcast %32 : vector<1x128xf32> to vector<16x128xf32>
    %34 = arith.addf %31, %33 : vector<16x128xf32>
    %cst_24 = arith.constant 0.000000e+00 : f32
    %35 = vector.broadcast %cst_24 : f32 to vector<16x128xf32>
    %36 = arith.maximumf %34, %35 : vector<16x128xf32>
    %37 = arith.truncf %36 : vector<16x128xf32> to vector<16x128xbf16>
    %c4 = arith.constant 4 : index
    %c0_25 = arith.constant 0 : index
    %c0_26 = arith.constant 0 : index
    %38 = vector.load %arg2[%c4, %c0_25, %c0_26] : memref<7x128x128xbf16, #tpu.memory_space<vmem>>, vector<1x128x128xbf16>
    %39 = vector.shape_cast %38 : vector<1x128x128xbf16> to vector<128x128xbf16>
    %cst_27 = arith.constant dense<0.000000e+00> : vector<16x128xf32>
    %40 = tpu.matmul %37, %39, %cst_27 {dimension_numbers = #tpu.dot_dimension_numbers<[1], [0], [0], [1], [0, 0, 1, 1], [], []>} : vector<16x128xbf16>, vector<128x128xbf16>, vector<16x128xf32> -> vector<16x128xf32>
    %c4_28 = arith.constant 4 : index
    %c0_29 = arith.constant 0 : index
    %41 = vector.load %arg3[%c4_28, %c0_29] : memref<7x128xf32, #tpu.memory_space<vmem>>, vector<1x128xf32>
    %42 = vector.broadcast %41 : vector<1x128xf32> to vector<16x128xf32>
    %43 = arith.addf %40, %42 : vector<16x128xf32>
    %cst_30 = arith.constant 0.000000e+00 : f32
    %44 = vector.broadcast %cst_30 : f32 to vector<16x128xf32>
    %45 = arith.maximumf %43, %44 : vector<16x128xf32>
    %46 = arith.truncf %45 : vector<16x128xf32> to vector<16x128xbf16>
    %c5 = arith.constant 5 : index
    %c0_31 = arith.constant 0 : index
    %c0_32 = arith.constant 0 : index
    %47 = vector.load %arg2[%c5, %c0_31, %c0_32] : memref<7x128x128xbf16, #tpu.memory_space<vmem>>, vector<1x128x128xbf16>
    %48 = vector.shape_cast %47 : vector<1x128x128xbf16> to vector<128x128xbf16>
    %cst_33 = arith.constant dense<0.000000e+00> : vector<16x128xf32>
    %49 = tpu.matmul %46, %48, %cst_33 {dimension_numbers = #tpu.dot_dimension_numbers<[1], [0], [0], [1], [0, 0, 1, 1], [], []>} : vector<16x128xbf16>, vector<128x128xbf16>, vector<16x128xf32> -> vector<16x128xf32>
    %c5_34 = arith.constant 5 : index
    %c0_35 = arith.constant 0 : index
    %50 = vector.load %arg3[%c5_34, %c0_35] : memref<7x128xf32, #tpu.memory_space<vmem>>, vector<1x128xf32>
    %51 = vector.broadcast %50 : vector<1x128xf32> to vector<16x128xf32>
    %52 = arith.addf %49, %51 : vector<16x128xf32>
    %cst_36 = arith.constant 0.000000e+00 : f32
    %53 = vector.broadcast %cst_36 : f32 to vector<16x128xf32>
    %54 = arith.maximumf %52, %53 : vector<16x128xf32>
    %55 = arith.truncf %54 : vector<16x128xf32> to vector<16x128xbf16>
    %c6 = arith.constant 6 : index
    %c0_37 = arith.constant 0 : index
    %c0_38 = arith.constant 0 : index
    %56 = vector.load %arg2[%c6, %c0_37, %c0_38] : memref<7x128x128xbf16, #tpu.memory_space<vmem>>, vector<1x128x128xbf16>
    %57 = vector.shape_cast %56 : vector<1x128x128xbf16> to vector<128x128xbf16>
    %cst_39 = arith.constant dense<0.000000e+00> : vector<16x128xf32>
    %58 = tpu.matmul %55, %57, %cst_39 {dimension_numbers = #tpu.dot_dimension_numbers<[1], [0], [0], [1], [0, 0, 1, 1], [], []>} : vector<16x128xbf16>, vector<128x128xbf16>, vector<16x128xf32> -> vector<16x128xf32>
    %c6_40 = arith.constant 6 : index
    %c0_41 = arith.constant 0 : index
    %59 = vector.load %arg3[%c6_40, %c0_41] : memref<7x128xf32, #tpu.memory_space<vmem>>, vector<1x128xf32>
    %60 = vector.broadcast %59 : vector<1x128xf32> to vector<16x128xf32>
    %61 = arith.addf %58, %60 : vector<16x128xf32>
    %62 = vector.extract_strided_slice %61 {offsets = [0, 0], sizes = [16, 1], strides = [1, 1]} : vector<16x128xf32> to vector<16x1xf32>
    %c0_42 = arith.constant 0 : index
    %c0_43 = arith.constant 0 : index
    %63 = vector.load %arg4[%c0_42, %c0_43] : memref<16x1xf32, #tpu.memory_space<vmem>>, vector<16x1xf32>
    tpu.vector_store %arg4[%c0_42, %c0_43], %62 {strides = array<i32>} : memref<16x1xf32, #tpu.memory_space<vmem>>, vector<16x1xf32>,
    return
  }
  func.func @transform_0(%arg0: i32) -> (i32, i32) {
    %c0_i32 = arith.constant 0 : i32
    %c0_i32_0 = arith.constant 0 : i32
    return %arg0, %c0_i32 : i32, i32
  }
  func.func @transform_1(%arg0: i32) -> (i32, i32, i32) {
    %c0_i32 = arith.constant 0 : i32
    %c0_i32_0 = arith.constant 0 : i32
    %c0_i32_1 = arith.constant 0 : i32
    %c0_i32_2 = arith.constant 0 : i32
    return %c0_i32, %c0_i32_0, %c0_i32_1 : i32, i32, i32
  }
  func.func @transform_2(%arg0: i32) -> (i32, i32) {
    %c0_i32 = arith.constant 0 : i32
    %c0_i32_0 = arith.constant 0 : i32
    %c0_i32_1 = arith.constant 0 : i32
    return %c0_i32, %c0_i32_0 : i32, i32
  }
  func.func @transform_3(%arg0: i32) -> (i32, i32) {
    %c0_i32 = arith.constant 0 : i32
    %c0_i32_0 = arith.constant 0 : i32
    return %arg0, %c0_i32 : i32, i32
  }
}

</mosaic_0001>

<bundles_post_ra>
// kernel: pitch_velocity_forward.1
= control target key start
LH: loop header
LB: loop body
LE: loop exit
PB: predicated region body
PF: predicated region fallthrough
CT: control target
= control target key end

     0   :  { %8 = vsyncpa [#allocation3], 0  ;;  %s869_s15 = smov [#allocation2]   ;;  %s870_s17 = smov 64   ;;  %s928_s0 = inlined_call_operand.vmem [shape: f32[16,32], index: 0, kind: input, shape index: {}]   ;;  %s929_s1 = inlined_call_operand.hbm [shape: bf16[7,128,128], index: 1, kind: input, shape index: {}]   ;;  %s930_s2 = inlined_call_operand.vmem [shape: f32[7,128], index: 2, kind: input, shape index: {}]   ;;  %s931_s3 = inlined_call_operand.vmem [shape: f32[16,1], index: 3, kind: output, shape index: {}]  }
   0x1   :  { %s15_s14 = sshll.u32 %s929_s1, 4  ;;  %s17_s16 = sshll.u32 %s869_s15, 4  ;;  %s16_s14 = int_to_ptr.hbm [resolvable:$true] %s15_s14  ;;  %s18_s16 = int_to_ptr.vmem [resolvable:$true] %s17_s16 }
   0x2   :  { %s871_s18 = smov 4  }
   0x3   :  { %23 = dma.hbm_to_vmem [thread:$0]  %s16_s14, 7168, %s18_s16, [#allocation3], %s870_s17, %s870_s17, %s871_s18  }
   0x4   :  { %867 = dma.done.wait [#allocation3], 7168  }
   0x5   :  { %868 = vsyncadd [#allocation3], 4294960128  ;;  %v784_v0 = vld [vmem:[#allocation2 + $0x8] sm:$0xff]  ;;  %v783_v1 = vld [vmem:[#allocation2] sm:$0xff]  ;;  %vm52_vm0 = vcmask 261120   ;;  %vm574_vm1 = vcmask 7168  }
   0x6   :  { %v792_v2 = vld [vmem:[#allocation2 + $0x78] sm:$0xff]  ;;  %62 = vmatpush.bf16.msra.mxu0 %v784_v0  ;;  %v31_v3 = vld [vmem:[%s928_s0] sm:$0xff]  ;;  %v32_v4 = vld [vmem:[%s928_s0 + $0x8] sm:$0xff] }
   0x7   :  { %140 = vmatpush.bf16.msra.mxu1 %v792_v2  ;;  %v791_v5 = vld [vmem:[#allocation2 + $0x70] sm:$0xff]  ;;  %v33_v6 = vpack.c.bf16 %v32_v4, %v31_v3  ;;  %v790_v7 = vld [vmem:[#allocation2 + $0x68] sm:$0xff]  ;;  %v789_v8 = vld [vmem:[#allocation2 + $0x60] sm:$0xff] }
   0x8   :  { %v788_v9 = vld [vmem:[#allocation2 + $0x58] sm:$0xff]  ;;  %v787_v10 = vld [vmem:[#allocation2 + $0x50] sm:$0xff]  ;;  %v786_v11 = vld [vmem:[#allocation2 + $0x48] sm:$0xff] }
   0x9   :  { %v785_v12 = vld [vmem:[#allocation2 + $0x40] sm:$0xff]  ;;  %v800_v13 = vld [vmem:[#allocation2 + $0xb8] sm:$0xff]  ;;  %v799_v14 = vld [vmem:[#allocation2 + $0xb0] sm:$0xff] }
   0xa   :  { %63 = vmatpush.bf16.msra.mxu0 %v783_v1  ;;  %224 = vmatpush.bf16.msra.mxu2 %v800_v13  ;;  %v798_v15 = vld [vmem:[#allocation2 + $0xa8] sm:$0xff]  ;;  %v797_v16 = vld [vmem:[#allocation2 + $0xa0] sm:$0xff]  ;;  %v796_v25 = vld [vmem:[#allocation2 + $0x98] sm:$0xff] }
   0xb   :  { %141 = vmatpush.bf16.msra.mxu1 %v791_v5  ;;  %v836_v18 = vld [vmem:[%s930_s2] ss:$0 sm:$0xff]  ;;  %v795_v26 = vld [vmem:[#allocation2 + $0x90] sm:$0xff]  ;;  %v794_v27 = vld [vmem:[#allocation2 + $0x88] sm:$0xff] }
   0xc   :  { %v793_v28 = vld [vmem:[#allocation2 + $0x80] sm:$0xff]  ;;  %v808_v29 = vld [vmem:[#allocation2 + $0xf8] sm:$0xff]  ;;  %v807_v30 = vld [vmem:[#allocation2 + $0xf0] sm:$0xff] }
   0xd   :  { %590 = vmatmul.msk.bf16.vlgmr.msra.gmra.mxu0 %vm52_vm0, %v33_v6  ;;  %308 = vmatpush.bf16.msra.mxu3 %v808_v29  ;;  %v806_v31 = vld [vmem:[#allocation2 + $0xe8] sm:$0xff]  ;;  %v805_v32 = vld [vmem:[#allocation2 + $0xe0] sm:$0xff]  ;;  %v804_v41 = vld [vmem:[#allocation2 + $0xd8] sm:$0xff] }
   0xe   :  { %225 = vmatpush.bf16.msra.mxu2 %v799_v14  ;;  %v837_v34 = vld [vmem:[%s930_s2 + $0x1] ss:$0 sm:$0xff]  ;;  %v803_v42 = vld [vmem:[#allocation2 + $0xd0] sm:$0xff]  ;;  %v802_v43 = vld [vmem:[#allocation2 + $0xc8] sm:$0xff] }
   0xf   :  { %142 = vmatpush.bf16.msra.mxu1 %v790_v7  ;;  %v801_v44 = vld [vmem:[#allocation2 + $0xc0] sm:$0xff]  ;;  %v816_v45 = vld [vmem:[#allocation2 + $0x138] sm:$0xff]  ;;  %v815_v46 = vld [vmem:[#allocation2 + $0x130] sm:$0xff] }
  0x10   :  { %392 = vmatpush.bf16.msrb.mxu0 %v816_v45  ;;  %v814_v47 = vld [vmem:[#allocation2 + $0x128] sm:$0xff]  ;;  %v813_v48 = vld [vmem:[#allocation2 + $0x120] sm:$0xff]  ;;  %v812_v57 = vld [vmem:[#allocation2 + $0x118] sm:$0xff] }
  0x11   :  { %309 = vmatpush.bf16.msra.mxu3 %v807_v30  ;;  %v838_v50 = vld [vmem:[%s930_s2 + $0x2] ss:$0 sm:$0xff]  ;;  %v811_v58 = vld [vmem:[#allocation2 + $0x110] sm:$0xff]  ;;  %v810_v59 = vld [vmem:[#allocation2 + $0x108] sm:$0xff] }
  0x12   :  { %226 = vmatpush.bf16.msra.mxu2 %v798_v15  ;;  %v809_v60 = vld [vmem:[#allocation2 + $0x100] sm:$0xff]  ;;  %v824_v61 = vld [vmem:[#allocation2 + $0x178] sm:$0xff]  ;;  %v823_v62 = vld [vmem:[#allocation2 + $0x170] sm:$0xff] }
  0x13   :  { %143 = vmatpush.bf16.msra.mxu1 %v789_v8  ;;  %v822_v63 = vld [vmem:[#allocation2 + $0x168] sm:$0xff]  ;;  %v821_v0 = vld [vmem:[#allocation2 + $0x160] sm:$0xff]  ;;  %v832_v13 = vld [vmem:[#allocation2 + $0x1b8] sm:$0xff] }
  0x14   :  { %393 = vmatpush.bf16.msrb.mxu0 %v815_v46  ;;  %v839_v2 = vld [vmem:[%s930_s2 + $0x3] ss:$0 sm:$0xff]  ;;  %v831_v14 = vld [vmem:[#allocation2 + $0x1b0] sm:$0xff]  ;;  %v830_v15 = vld [vmem:[#allocation2 + $0x1a8] sm:$0xff] }
  0x15   :  { %310 = vmatpush.bf16.msra.mxu3 %v806_v31  ;;  %v841_v30 = vld [vmem:[%s930_s2 + $0x5] ss:$0 sm:$0xff] }
  0x16   :  { %227 = vmatpush.bf16.msra.mxu2 %v797_v16  ;;  %v829_v16 = vld [vmem:[#allocation2 + $0x1a0] sm:$0xff] }
  0x17   :  { %144 = vmatpush.bf16.msra.mxu1 %v788_v9  ;;  %v820_v9 = vld [vmem:[#allocation2 + $0x158] sm:$0xff] }
  0x18   :  { %394 = vmatpush.bf16.msrb.mxu0 %v814_v47 }
  0x19   :  { %311 = vmatpush.bf16.msra.mxu3 %v805_v32 }
  0x1a   :  { %228 = vmatpush.bf16.msra.mxu2 %v796_v25  ;;  %v828_v25 = vld [vmem:[#allocation2 + $0x198] sm:$0xff] }
  0x1b   :  { %145 = vmatpush.bf16.msra.mxu1 %v787_v10  ;;  %v819_v10 = vld [vmem:[#allocation2 + $0x150] sm:$0xff] }
  0x1c   :  { %395 = vmatpush.bf16.msrb.mxu0 %v813_v48 }
  0x1d   :  { %312 = vmatpush.bf16.msra.mxu3 %v804_v41 }
  0x1e   :  { %229 = vmatpush.bf16.msra.mxu2 %v795_v26  ;;  %v827_v26 = vld [vmem:[#allocation2 + $0x190] sm:$0xff] }
  0x1f   :  { %146 = vmatpush.bf16.msra.mxu1 %v786_v11  ;;  %v818_v11 = vld [vmem:[#allocation2 + $0x148] sm:$0xff] }
  0x20   :  { %396 = vmatpush.bf16.msrb.mxu0 %v812_v57 }
  0x21   :  { %313 = vmatpush.bf16.msra.mxu3 %v803_v42 }
  0x22   :  { %230 = vmatpush.bf16.msra.mxu2 %v794_v27  ;;  %v826_v27 = vld [vmem:[#allocation2 + $0x188] sm:$0xff] }
  0x23   :  { %147 = vmatpush.bf16.msra.mxu1 %v785_v12  ;;  %v817_v12 = vld [vmem:[#allocation2 + $0x140] sm:$0xff] }
  0x24   :  { %397 = vmatpush.bf16.msrb.mxu0 %v811_v58 }
  0x25   :  { %314 = vmatpush.bf16.msra.mxu3 %v802_v43 }
  0x26   :  { %231 = vmatpush.bf16.msra.mxu2 %v793_v28  ;;  %v825_v28 = vld [vmem:[#allocation2 + $0x180] sm:$0xff] }
  0x27   :  { %476 = vmatpush.bf16.msrb.mxu1 %v824_v61 }
  0x28   :  { %398 = vmatpush.bf16.msrb.mxu0 %v810_v59 }
  0x29   :  { %315 = vmatpush.bf16.msra.mxu3 %v801_v44 }
  0x2a   :  { %560 = vmatpush.bf16.msrb.mxu2 %v832_v13 }
  0x2b   :  { %477 = vmatpush.bf16.msrb.mxu1 %v823_v62 }
  0x2c   :  { %399 = vmatpush.bf16.msrb.mxu0 %v809_v60 }
  0x2e   :  { %561 = vmatpush.bf16.msrb.mxu2 %v831_v14 }
  0x2f   :  { %478 = vmatpush.bf16.msrb.mxu1 %v822_v63 }
  0x32   :  { %562 = vmatpush.bf16.msrb.mxu2 %v830_v15 }
  0x33   :  { %479 = vmatpush.bf16.msrb.mxu1 %v821_v0 }
  0x36   :  { %563 = vmatpush.bf16.msrb.mxu2 %v829_v16 }
  0x37   :  { %480 = vmatpush.bf16.msrb.mxu1 %v820_v9 }
  0x3a   :  { %564 = vmatpush.bf16.msrb.mxu2 %v828_v25 }
  0x3b   :  { %481 = vmatpush.bf16.msrb.mxu1 %v819_v10 }
  0x3e   :  { %565 = vmatpush.bf16.msrb.mxu2 %v827_v26 }
  0x3f   :  { %482 = vmatpush.bf16.msrb.mxu1 %v818_v11 }
  0x42   :  { %566 = vmatpush.bf16.msrb.mxu2 %v826_v27 }
  0x43   :  { %483 = vmatpush.bf16.msrb.mxu1 %v817_v12 }
  0x46   :  { %567 = vmatpush.bf16.msrb.mxu2 %v825_v28 }
  0x8a   :  { %v65_v17 = vpop.f32.mrf.mxu0 }
  0x8b   :  { %v66_v19 = vadd.f32 %v836_v18, %v65_v17 }
  0x8d   :  { %v70_v22 = vmax.f32 %v66_v19, 0.0 }
  0x92   :  { %v67_v20 = vpop.f32.mrf.mxu0 }
  0x93   :  { %v68_v21 = vadd.f32 %v836_v18, %v67_v20  ;;  %v840_v18 = vld [vmem:[%s930_s2 + $0x4] ss:$0 sm:$0xff] }
  0x95   :  { %v71_v23 = vmax.f32 %v68_v21, 0.0 }
  0x97   :  { %v72_v24 = vpack.c.bf16 %v71_v23, %v70_v22 }
  0x99   :  { %148 = vmatmul.bf16.vlgmr.msra.gmra.mxu1 %v72_v24 }
 0x116   :  { %v149_v33 = vpop.f32.mrf.mxu1 }
 0x117   :  { %v150_v35 = vadd.f32 %v837_v34, %v149_v33 }
 0x119   :  { %v154_v38 = vmax.f32 %v150_v35, 0.0 }
 0x11e   :  { %v151_v36 = vpop.f32.mrf.mxu1 }
 0x11f   :  { %v152_v37 = vadd.f32 %v837_v34, %v151_v36 }
 0x121   :  { %v155_v39 = vmax.f32 %v152_v37, 0.0  ;;  %v842_v37 = vld [vmem:[%s930_s2 + $0x6] ss:$0 sm:$0xff] }
 0x123   :  { %v156_v40 = vpack.c.bf16 %v155_v39, %v154_v38 }
 0x125   :  { %232 = vmatmul.bf16.vlgmr.msra.gmra.mxu2 %v156_v40 }
 0x1a8   :  { %v233_v49 = vpop.f32.mrf.mxu2 }
 0x1a9   :  { %v234_v51 = vadd.f32 %v838_v50, %v233_v49 }
 0x1ab   :  { %v238_v54 = vmax.f32 %v234_v51, 0.0 }
 0x1b0   :  { %v235_v52 = vpop.f32.mrf.mxu2 }
 0x1b1   :  { %v236_v53 = vadd.f32 %v838_v50, %v235_v52 }
 0x1b3   :  { %v239_v55 = vmax.f32 %v236_v53, 0.0 }
 0x1b5   :  { %v240_v56 = vpack.c.bf16 %v239_v55, %v238_v54 }
 0x1b7   :  { %316 = vmatmul.bf16.vlgmr.msra.gmra.mxu3 %v240_v56 }
 0x23a   :  { %v317_v1 = vpop.f32.mrf.mxu3 }
 0x23b   :  { %v318_v3 = vadd.f32 %v839_v2, %v317_v1 }
 0x23d   :  { %v322_v6 = vmax.f32 %v318_v3, 0.0 }
 0x242   :  { %v319_v4 = vpop.f32.mrf.mxu3 }
 0x243   :  { %v320_v5 = vadd.f32 %v839_v2, %v319_v4 }
 0x245   :  { %v323_v7 = vmax.f32 %v320_v5, 0.0 }
 0x247   :  { %v324_v8 = vpack.c.bf16 %v323_v7, %v322_v6 }
 0x249   :  { %400 = vmatmul.bf16.vlgmr.msrb.gmra.mxu0 %v324_v8 }
 0x2c6   :  { %v401_v17 = vpop.f32.mrf.mxu0 }
 0x2c7   :  { %v402_v19 = vadd.f32 %v840_v18, %v401_v17 }
 0x2c9   :  { %v406_v22 = vmax.f32 %v402_v19, 0.0 }
 0x2ce   :  { %v403_v20 = vpop.f32.mrf.mxu0 }
 0x2cf   :  { %v404_v21 = vadd.f32 %v840_v18, %v403_v20 }
 0x2d1   :  { %v407_v23 = vmax.f32 %v404_v21, 0.0 }
 0x2d3   :  { %v408_v24 = vpack.c.bf16 %v407_v23, %v406_v22 }
 0x2d5   :  { %484 = vmatmul.bf16.vlgmr.msrb.gmra.mxu1 %v408_v24 }
 0x352   :  { %v485_v29 = vpop.f32.mrf.mxu1 }
 0x353   :  { %v486_v31 = vadd.f32 %v841_v30, %v485_v29 }
 0x355   :  { %v490_v34 = vmax.f32 %v486_v31, 0.0 }
 0x35a   :  { %v487_v32 = vpop.f32.mrf.mxu1 }
 0x35b   :  { %v488_v33 = vadd.f32 %v841_v30, %v487_v32 }
 0x35d   :  { %v491_v35 = vmax.f32 %v488_v33, 0.0 }
 0x35f   :  { %v492_v36 = vpack.c.bf16 %v491_v35, %v490_v34 }
 0x361   :  { %568 = vmatmul.bf16.vlgmr.msrb.gmra.mxu2 %v492_v36 }
 0x3e4   :  { %v569_v38 = vpop.f32.mrf.mxu2 }
 0x3e5   :  { %v570_v39 = vadd.f32 %v842_v37, %v569_v38 }
 0x3e7   :  { %575 = vst.msk [vmem:[%s931_s3] sm:$0xff] %vm574_vm1, %v570_v39 }
 0x3ec   :  { %v571_v40 = vpop.f32.mrf.mxu2 }
 0x3ed   :  { %v572_v41 = vadd.f32 %v842_v37, %v571_v40 }
 0x3ef   :  { %576 = vst.msk [vmem:[%s931_s3 + $0x8] sm:$0xff] %vm574_vm1, %v572_v41 }
 0x3f0   :  { %581 = vsyncpa [#allocation3], 1 }

</bundles_post_ra>
